<compile_context>
chip_gen: v5e
topology: v5e:2x2
jax: 0.10.0
libtpu: 0.0.40
codegen_flags: <defaults>
</compile_context>

<pallas_src>
import jax
import jax.numpy as jnp
from jax.experimental import pallas as pl
from jax.experimental.pallas import tpu as pltpu

SPEED_OF_SOUND = 343.0
DELAY_SCALE = 1000.0 / SPEED_OF_SOUND
MOUTH_OFFSET = (0.09, 0.0, -0.2)       # my == 0, exploited below
LEFT_EAR = (0.0, -0.08, -0.22)         # ear x offsets are both 0, z offsets equal
RIGHT_EAR = (0.0, 0.08, -0.22)


def _warpfield_kernel(view_ref, out_ref):
    # view_ref: (7, rb, 128) f32 in VMEM -> each channel is a dense (8,128)-tiled slab
    px = view_ref[0]
    py = view_ref[1]
    pz = view_ref[2]
    qx = view_ref[3]
    qy = view_ref[4]
    qz = view_ref[5]
    qw = view_ref[6]

    # scipy-style zero-quaternion guard: add 1 to every component where ||q|| == 0.
    # sumsq == 0  <=>  norm == 0 in f32, so the sqrt is skipped (saves an EUP op).
    sumsq = qx * qx + qy * qy + qz * qz + qw * qw
    eps = (sumsq == 0.0).astype(jnp.float32)
    qx = qx + eps
    qy = qy + eps
    qz = qz + eps
    qw = qw + eps

    # R.from_quat normalizes the quaternion
    inv_norm = jax.lax.rsqrt(qx * qx + qy * qy + qz * qz + qw * qw)
    qx = qx * inv_norm
    qy = qy * inv_norm
    qz = qz * inv_norm
    qw = qw * inv_norm

    # cross / square products, each computed once
    xx = qx * qx
    yy = qy * qy
    zz = qz * qz
    xy = qx * qy
    xz = qx * qz
    xw = qx * qw
    yz = qy * qz
    yw = qy * qw
    zw = qz * qw

    mx, _, mz = MOUTH_OFFSET
    # transmitter_mouth = R(q)^T @ mouth_offset  (apply inverse rotation), my == 0
    tm_x = mx - 2.0 * (yy + zz) * mx + 2.0 * (xz - yw) * mz
    tm_y = 2.0 * (xy - zw) * mx + 2.0 * (yz + xw) * mz
    tm_z = 2.0 * (xz + yw) * mx + mz - 2.0 * (xx + yy) * mz

    hx = px + tm_x
    hy = py + tm_y
    hz = pz + tm_z

    # both ears have x offset 0 and the same z offset -> share the x/z contribution
    dx = hx - LEFT_EAR[0]
    dz = hz - LEFT_EAR[2]
    xz_sq = dx * dx + dz * dz
    dly = hy - LEFT_EAR[1]
    dry = hy - RIGHT_EAR[1]

    # direct row stores, /343*1000 folded into one multiply
    out_ref[0] = jnp.sqrt(xz_sq + dly * dly) * DELAY_SCALE
    out_ref[1] = jnp.sqrt(xz_sq + dry * dry) * DELAY_SCALE


def geometric_warpfield(view, *, rows_block=512):
    """view: (B, 7, T) -> delay: (B, 2, T) float32.

    rows_block counts (8,128)-row groups of frames per grid step; 512 rows = 64K
    frames/block keeps the kernel far from per-step overhead while staying < 5 MiB
    of double-buffered VMEM on every TPU generation.
    """
    B, C, T = view.shape
    assert C == 7, "view must have 7 channels (xyz + quaternion)"
    view = view.astype(jnp.float32)

    rows = pl.cdiv(T, 128)                 # lane-groups of frames per batch row
    rb = min(rows_block, rows)
    rb = ((rb + 7) // 8) * 8               # sublane multiple
    n_blocks = pl.cdiv(rows, rb)
    rows_p = n_blocks * rb
    Tp = rows_p * 128

    if Tp != T:
        # zero padding is safe: zero quats hit the +1 guard, results stay finite
        view = jnp.pad(view, ((0, 0), (0, 0), (0, Tp - T)))
    # free (metadata-only) reshape: frames become dense (rows, 128) slabs per channel
    packed = view.reshape(B, 7, rows_p, 128)

    out_packed = pl.pallas_call(
        _warpfield_kernel,
        out_shape=jax.ShapeDtypeStruct((B, 2, rows_p, 128), jnp.float32),
        grid_spec=pltpu.PrefetchScalarGridSpec(
            num_scalar_prefetch=0,
            grid=(B, n_blocks),
            in_specs=[pl.BlockSpec((pl.Squeezed(), 7, rb, 128),
                                   lambda b, t: (b, 0, t, 0))],
            out_specs=pl.BlockSpec((pl.Squeezed(), 2, rb, 128),
                                   lambda b, t: (b, 0, t, 0)),
        ),
        compiler_params=pltpu.CompilerParams(
            dimension_semantics=("parallel", "parallel"),
            vmem_limit_bytes=32 * 1024 * 1024,
        ),
    )(packed)

    out = out_packed.reshape(B, 2, Tp)
    if Tp != T:
        out = out[:, :, :T]
    return out


def _reference(view):
    """Pure-JAX reference (same math as the torch/scipy module)."""
    view = view.astype(jnp.float32)
    pos = view[:, 0:3, :]
    q = view[:, 3:7, :]  # (B, 4, T), scipy order (x, y, z, w)
    norm = jnp.sqrt(jnp.sum(q * q, axis=1, keepdims=True))
    q = q + (norm == 0.0).astype(jnp.float32)
    q = q / jnp.sqrt(jnp.sum(q * q, axis=1, keepdims=True))
    qx, qy, qz, qw = q[:, 0], q[:, 1], q[:, 2], q[:, 3]
    mx, _, mz = MOUTH_OFFSET
    tm_x = (1.0 - 2.0 * (qy * qy + qz * qz)) * mx + 2.0 * (qx * qz - qy * qw) * mz
    tm_y = 2.0 * (qx * qy - qz * qw) * mx + 2.0 * (qy * qz + qx * qw) * mz
    tm_z = 2.0 * (qx * qz + qy * qw) * mx + (1.0 - 2.0 * (qx * qx + qy * qy)) * mz
    tm = jnp.stack([tm_x, tm_y, tm_z], axis=1)  # (B, 3, T)
    left = jnp.asarray(LEFT_EAR, jnp.float32)[None, :, None]
    right = jnp.asarray(RIGHT_EAR, jnp.float32)[None, :, None]
    disp_l = pos + tm - left
    disp_r = pos + tm - right
    disp = jnp.stack([disp_l, disp_r], axis=1)  # (B, 2, 3, T)
    dist = jnp.sqrt(jnp.sum(disp * disp, axis=2))
    return dist / SPEED_OF_SOUND * 1000.0


if __name__ == "__main__":
    B, T = 2, 256  # (batch, frames); 7 channels fixed by the module
    key = jax.random.PRNGKey(0)
    k_pos, k_quat = jax.random.split(key)
    pos = jax.random.normal(k_pos, (B, 3, T), jnp.float32)
    quat = jax.random.normal(k_quat, (B, 4, T), jnp.float32)
    view = jnp.concatenate([pos, quat], axis=1)  # (B, 7, T)
    # exercise the zero-quaternion guard path on one frame
    view = view.at[0, 3:7, 0].set(0.0)

    out = geometric_warpfield(view)
    out = jax.block_until_ready(out)

    ref = _reference(view)
    assert out.shape == (B, 2, T)
    assert jnp.allclose(out, ref, atol=1e-5, rtol=1e-5), "mismatch vs reference"
    print("KERNEL_OK")
</pallas_src>

<mosaic_0001>
module attributes {stable_mosaic.version = 11 : i64} {
  func.func @_warpfield_kernel(%arg0: i32, %arg1: i32, %arg2: memref<1x7x8x128xf32, #tpu.memory_space<vmem>>, %arg3: memref<1x2x8x128xf32, #tpu.memory_space<vmem>>) attributes {dimension_semantics = [#tpu.dimension_semantics<parallel>, #tpu.dimension_semantics<parallel>], iteration_bounds = array<i64: 2, 1>, scalar_prefetch = 0 : i64, scratch_operands = 0 : i64, tpu.core_type = #tpu.core_type<tc>, window_params = [{transform_indices = @transform_0, window_bounds = array<i64: 1, 7, 8, 128>}, {transform_indices = @transform_1, window_bounds = array<i64: 1, 2, 8, 128>}]} {
    %c0 = arith.constant 0 : index
    %c0_0 = arith.constant 0 : index
    %c0_1 = arith.constant 0 : index
    %c0_2 = arith.constant 0 : index
    %0 = vector.load %arg2[%c0, %c0_0, %c0_1, %c0_2] : memref<1x7x8x128xf32, #tpu.memory_space<vmem>>, vector<1x1x8x128xf32>
    %1 = vector.shape_cast %0 : vector<1x1x8x128xf32> to vector<8x128xf32>
    %c0_3 = arith.constant 0 : index
    %c1 = arith.constant 1 : index
    %c0_4 = arith.constant 0 : index
    %c0_5 = arith.constant 0 : index
    %2 = vector.load %arg2[%c0_3, %c1, %c0_4, %c0_5] : memref<1x7x8x128xf32, #tpu.memory_space<vmem>>, vector<1x1x8x128xf32>
    %3 = vector.shape_cast %2 : vector<1x1x8x128xf32> to vector<8x128xf32>
    %c0_6 = arith.constant 0 : index
    %c2 = arith.constant 2 : index
    %c0_7 = arith.constant 0 : index
    %c0_8 = arith.constant 0 : index
    %4 = vector.load %arg2[%c0_6, %c2, %c0_7, %c0_8] : memref<1x7x8x128xf32, #tpu.memory_space<vmem>>, vector<1x1x8x128xf32>
    %5 = vector.shape_cast %4 : vector<1x1x8x128xf32> to vector<8x128xf32>
    %c0_9 = arith.constant 0 : index
    %c3 = arith.constant 3 : index
    %c0_10 = arith.constant 0 : index
    %c0_11 = arith.constant 0 : index
    %6 = vector.load %arg2[%c0_9, %c3, %c0_10, %c0_11] : memref<1x7x8x128xf32, #tpu.memory_space<vmem>>, vector<1x1x8x128xf32>
    %7 = vector.shape_cast %6 : vector<1x1x8x128xf32> to vector<8x128xf32>
    %c0_12 = arith.constant 0 : index
    %c4 = arith.constant 4 : index
    %c0_13 = arith.constant 0 : index
    %c0_14 = arith.constant 0 : index
    %8 = vector.load %arg2[%c0_12, %c4, %c0_13, %c0_14] : memref<1x7x8x128xf32, #tpu.memory_space<vmem>>, vector<1x1x8x128xf32>
    %9 = vector.shape_cast %8 : vector<1x1x8x128xf32> to vector<8x128xf32>
    %c0_15 = arith.constant 0 : index
    %c5 = arith.constant 5 : index
    %c0_16 = arith.constant 0 : index
    %c0_17 = arith.constant 0 : index
    %10 = vector.load %arg2[%c0_15, %c5, %c0_16, %c0_17] : memref<1x7x8x128xf32, #tpu.memory_space<vmem>>, vector<1x1x8x128xf32>
    %11 = vector.shape_cast %10 : vector<1x1x8x128xf32> to vector<8x128xf32>
    %c0_18 = arith.constant 0 : index
    %c6 = arith.constant 6 : index
    %c0_19 = arith.constant 0 : index
    %c0_20 = arith.constant 0 : index
    %12 = vector.load %arg2[%c0_18, %c6, %c0_19, %c0_20] : memref<1x7x8x128xf32, #tpu.memory_space<vmem>>, vector<1x1x8x128xf32>
    %13 = vector.shape_cast %12 : vector<1x1x8x128xf32> to vector<8x128xf32>
    %14 = arith.mulf %7, %7 : vector<8x128xf32>
    %15 = arith.mulf %9, %9 : vector<8x128xf32>
    %16 = arith.addf %14, %15 : vector<8x128xf32>
    %17 = arith.mulf %11, %11 : vector<8x128xf32>
    %18 = arith.addf %16, %17 : vector<8x128xf32>
    %19 = arith.mulf %13, %13 : vector<8x128xf32>
    %20 = arith.addf %18, %19 : vector<8x128xf32>
    %cst = arith.constant 0.000000e+00 : f32
    %21 = vector.broadcast %cst : f32 to vector<8x128xf32>
    %22 = arith.cmpf oeq, %20, %21 : vector<8x128xf32>
    %23 = arith.extui %22 : vector<8x128xi1> to vector<8x128xi32>
    %24 = arith.sitofp %23 : vector<8x128xi32> to vector<8x128xf32>
    %25 = arith.addf %7, %24 : vector<8x128xf32>
    %26 = arith.addf %9, %24 : vector<8x128xf32>
    %27 = arith.addf %11, %24 : vector<8x128xf32>
    %28 = arith.addf %13, %24 : vector<8x128xf32>
    %29 = arith.mulf %25, %25 : vector<8x128xf32>
    %30 = arith.mulf %26, %26 : vector<8x128xf32>
    %31 = arith.addf %29, %30 : vector<8x128xf32>
    %32 = arith.mulf %27, %27 : vector<8x128xf32>
    %33 = arith.addf %31, %32 : vector<8x128xf32>
    %34 = arith.mulf %28, %28 : vector<8x128xf32>
    %35 = arith.addf %33, %34 : vector<8x128xf32>
    %36 = math.rsqrt %35 : vector<8x128xf32>
    %37 = arith.mulf %25, %36 : vector<8x128xf32>
    %38 = arith.mulf %26, %36 : vector<8x128xf32>
    %39 = arith.mulf %27, %36 : vector<8x128xf32>
    %40 = arith.mulf %28, %36 : vector<8x128xf32>
    %41 = arith.mulf %37, %37 : vector<8x128xf32>
    %42 = arith.mulf %38, %38 : vector<8x128xf32>
    %43 = arith.mulf %39, %39 : vector<8x128xf32>
    %44 = arith.mulf %37, %38 : vector<8x128xf32>
    %45 = arith.mulf %37, %39 : vector<8x128xf32>
    %46 = arith.mulf %37, %40 : vector<8x128xf32>
    %47 = arith.mulf %38, %39 : vector<8x128xf32>
    %48 = arith.mulf %38, %40 : vector<8x128xf32>
    %49 = arith.mulf %39, %40 : vector<8x128xf32>
    %50 = arith.addf %42, %43 : vector<8x128xf32>
    %cst_21 = arith.constant 2.000000e+00 : f32
    %51 = vector.broadcast %cst_21 : f32 to vector<8x128xf32>
    %52 = arith.mulf %51, %50 : vector<8x128xf32>
    %cst_22 = arith.constant 9.000000e-02 : f32
    %53 = vector.broadcast %cst_22 : f32 to vector<8x128xf32>
    %54 = arith.mulf %52, %53 : vector<8x128xf32>
    %cst_23 = arith.constant 9.000000e-02 : f32
    %55 = vector.broadcast %cst_23 : f32 to vector<8x128xf32>
    %56 = arith.subf %55, %54 : vector<8x128xf32>
    %57 = arith.subf %45, %48 : vector<8x128xf32>
    %cst_24 = arith.constant 2.000000e+00 : f32
    %58 = vector.broadcast %cst_24 : f32 to vector<8x128xf32>
    %59 = arith.mulf %58, %57 : vector<8x128xf32>
    %cst_25 = arith.constant -2.000000e-01 : f32
    %60 = vector.broadcast %cst_25 : f32 to vector<8x128xf32>
    %61 = arith.mulf %59, %60 : vector<8x128xf32>
    %62 = arith.addf %56, %61 : vector<8x128xf32>
    %63 = arith.subf %44, %49 : vector<8x128xf32>
    %cst_26 = arith.constant 2.000000e+00 : f32
    %64 = vector.broadcast %cst_26 : f32 to vector<8x128xf32>
    %65 = arith.mulf %64, %63 : vector<8x128xf32>
    %cst_27 = arith.constant 9.000000e-02 : f32
    %66 = vector.broadcast %cst_27 : f32 to vector<8x128xf32>
    %67 = arith.mulf %65, %66 : vector<8x128xf32>
    %68 = arith.addf %47, %46 : vector<8x128xf32>
    %cst_28 = arith.constant 2.000000e+00 : f32
    %69 = vector.broadcast %cst_28 : f32 to vector<8x128xf32>
    %70 = arith.mulf %69, %68 : vector<8x128xf32>
    %cst_29 = arith.constant -2.000000e-01 : f32
    %71 = vector.broadcast %cst_29 : f32 to vector<8x128xf32>
    %72 = arith.mulf %70, %71 : vector<8x128xf32>
    %73 = arith.addf %67, %72 : vector<8x128xf32>
    %74 = arith.addf %45, %48 : vector<8x128xf32>
    %cst_30 = arith.constant 2.000000e+00 : f32
    %75 = vector.broadcast %cst_30 : f32 to vector<8x128xf32>
    %76 = arith.mulf %75, %74 : vector<8x128xf32>
    %cst_31 = arith.constant 9.000000e-02 : f32
    %77 = vector.broadcast %cst_31 : f32 to vector<8x128xf32>
    %78 = arith.mulf %76, %77 : vector<8x128xf32>
    %cst_32 = arith.constant -2.000000e-01 : f32
    %79 = vector.broadcast %cst_32 : f32 to vector<8x128xf32>
    %80 = arith.addf %78, %79 : vector<8x128xf32>
    %81 = arith.addf %41, %42 : vector<8x128xf32>
    %cst_33 = arith.constant 2.000000e+00 : f32
    %82 = vector.broadcast %cst_33 : f32 to vector<8x128xf32>
    %83 = arith.mulf %82, %81 : vector<8x128xf32>
    %cst_34 = arith.constant -2.000000e-01 : f32
    %84 = vector.broadcast %cst_34 : f32 to vector<8x128xf32>
    %85 = arith.mulf %83, %84 : vector<8x128xf32>
    %86 = arith.subf %80, %85 : vector<8x128xf32>
    %87 = arith.addf %1, %62 : vector<8x128xf32>
    %88 = arith.addf %3, %73 : vector<8x128xf32>
    %89 = arith.addf %5, %86 : vector<8x128xf32>
    %cst_35 = arith.constant 0.000000e+00 : f32
    %90 = vector.broadcast %cst_35 : f32 to vector<8x128xf32>
    %91 = arith.subf %87, %90 : vector<8x128xf32>
    %cst_36 = arith.constant -2.200000e-01 : f32
    %92 = vector.broadcast %cst_36 : f32 to vector<8x128xf32>
    %93 = arith.subf %89, %92 : vector<8x128xf32>
    %94 = arith.mulf %91, %91 : vector<8x128xf32>
    %95 = arith.mulf %93, %93 : vector<8x128xf32>
    %96 = arith.addf %94, %95 : vector<8x128xf32>
    %cst_37 = arith.constant -8.000000e-02 : f32
    %97 = vector.broadcast %cst_37 : f32 to vector<8x128xf32>
    %98 = arith.subf %88, %97 : vector<8x128xf32>
    %cst_38 = arith.constant 8.000000e-02 : f32
    %99 = vector.broadcast %cst_38 : f32 to vector<8x128xf32>
    %100 = arith.subf %88, %99 : vector<8x128xf32>
    %101 = arith.mulf %98, %98 : vector<8x128xf32>
    %102 = arith.addf %96, %101 : vector<8x128xf32>
    %103 = math.sqrt %102 : vector<8x128xf32>
    %cst_39 = arith.constant 2.915452 : f32
    %104 = vector.broadcast %cst_39 : f32 to vector<8x128xf32>
    %105 = arith.mulf %103, %104 : vector<8x128xf32>
    %c0_40 = arith.constant 0 : index
    %c0_41 = arith.constant 0 : index
    %c0_42 = arith.constant 0 : index
    %c0_43 = arith.constant 0 : index
    %106 = vector.load %arg3[%c0_40, %c0_41, %c0_42, %c0_43] : memref<1x2x8x128xf32, #tpu.memory_space<vmem>>, vector<1x1x8x128xf32>
    %107 = vector.shape_cast %106 : vector<1x1x8x128xf32> to vector<8x128xf32>
    %108 = vector.shape_cast %105 : vector<8x128xf32> to vector<1x1x8x128xf32>
    tpu.vector_store %arg3[%c0_40, %c0_41, %c0_42, %c0_43], %108 {strides = array<i32>} : memref<1x2x8x128xf32, #tpu.memory_space<vmem>>, vector<1x1x8x128xf32>,
    %109 = arith.mulf %100, %100 : vector<8x128xf32>
    %110 = arith.addf %96, %109 : vector<8x128xf32>
    %111 = math.sqrt %110 : vector<8x128xf32>
    %cst_44 = arith.constant 2.915452 : f32
    %112 = vector.broadcast %cst_44 : f32 to vector<8x128xf32>
    %113 = arith.mulf %111, %112 : vector<8x128xf32>
    %c0_45 = arith.constant 0 : index
    %c1_46 = arith.constant 1 : index
    %c0_47 = arith.constant 0 : index
    %c0_48 = arith.constant 0 : index
    %114 = vector.load %arg3[%c0_45, %c1_46, %c0_47, %c0_48] : memref<1x2x8x128xf32, #tpu.memory_space<vmem>>, vector<1x1x8x128xf32>
    %115 = vector.shape_cast %114 : vector<1x1x8x128xf32> to vector<8x128xf32>
    %116 = vector.shape_cast %113 : vector<8x128xf32> to vector<1x1x8x128xf32>
    tpu.vector_store %arg3[%c0_45, %c1_46, %c0_47, %c0_48], %116 {strides = array<i32>} : memref<1x2x8x128xf32, #tpu.memory_space<vmem>>, vector<1x1x8x128xf32>,
    return
  }
  func.func @transform_0(%arg0: i32, %arg1: i32) -> (i32, i32, i32, i32) {
    %c0_i32 = arith.constant 0 : i32
    %c0_i32_0 = arith.constant 0 : i32
    %c0_i32_1 = arith.constant 0 : i32
    return %arg0, %c0_i32, %arg1, %c0_i32_0 : i32, i32, i32, i32
  }
  func.func @transform_1(%arg0: i32, %arg1: i32) -> (i32, i32, i32, i32) {
    %c0_i32 = arith.constant 0 : i32
    %c0_i32_0 = arith.constant 0 : i32
    %c0_i32_1 = arith.constant 0 : i32
    return %arg0, %c0_i32, %arg1, %c0_i32_0 : i32, i32, i32, i32
  }
}

</mosaic_0001>

<bundles_post_ra>
// kernel: tpu_custom_call.1
= control target key start
LH: loop header
LB: loop body
LE: loop exit
PB: predicated region body
PF: predicated region fallthrough
CT: control target
= control target key end

     0   :  { %6 = vsyncpa [#allocation3], 0  ;;  %s737_s0 = inlined_call_operand.hbm [shape: f32[2,7,8,128], index: 0, kind: input, shape index: {}]   ;;  %s738_s1 = inlined_call_operand.hbm [shape: f32[2,2,8,128], index: 1, kind: output, shape index: {}]  }
   0x1   :  { %8 = vsyncpa [#allocation3 + $0x1], 0 }
   0x2   :  { %9 = vsyncpa [#allocation4], 0 }
   0x3   :  { %11 = vsyncpa [#allocation4 + $0x1], 0  ;;  %s607_s6 = smov 0   ;;  %s609_s7 = smov 0  }
   0x4   :  { %s611_s8 = smov 0   ;;  %s613_s9 = smov 0  }
   0x5   :  { %s615_s10 = smov 0   ;;  %s617_s11 = smov 0  }
   0x6 LB: > { %s378_s12 = sadd.s32 4294967295, %s590_s11   ;;  %s379_s13 = sadd.s32 4294967294, %s590_s11   ;;  %s590_s11 = sphi %s617_s11, %s17_s11   ;;  %s586_s10 = sphi %s615_s10, %s747_s10   ;;  %s582_s9 = sphi %s613_s9, %s746_s9   ;;  %s578_s8 = sphi %s611_s8, %s745_s8   ;;  %s574_s7 = sphi %s609_s7, %s744_s7   ;;  %s570_s6 = sphi %s607_s6, %s743_s6  }
   0x7   : > { %s29_s14 = sadd.s32 1, %s586_s10  ;;  %s38_s15 = sadd.s32 1, %s578_s8 }
   0x8   : > { %p31_p0 = scmp.ge.s32.totalorder %s29_s14, 2  ;;  %p45_p1 = scmp.ne.s32.totalorder %s578_s8, %s574_s7 }
   0x9   : > { %p46_p2 = scmp.eq.s32.totalorder %s590_s11, 0  ;;  %p51_p3 = scmp.ne.s32.totalorder %s574_s7, %s570_s6 }
   0xa   : > { %s749_s14 = smov (%p31_p0, %s29_s14), 0  ;;  %p52_p5 = scmp.eq.s32.totalorder %s378_s12, 0 }
   0xb   : > { %p648_p4 = por %p46_p2, %p45_p1  ;;  %s33_s17 = ssub.s32 %s586_s10, %s749_s14 }
   0xc   : > { %p77_p6 = scmp.eq.s32.totalorder %s378_s12, 1  ;;  %p36_p7 = scmp.eq.s32.totalorder %s33_s17, 0 }
   0xd   : > { %p654_p8 = por %p52_p5, %p51_p3  ;;  %p83_p10 = scmp.eq.s32.totalorder %s379_s13, 1 }
   0xe   : > { %p658_p9 = por %p77_p6, %p45_p1  ;;  %p381_p12 = scmp.ge.s32.totalorder %s590_s11, 2 }
   0xf   : > { %s663_s20 = scalar_select %p36_p7, %s578_s8, %s38_s15  }
  0x10   : > { %p665_p11 = por %p83_p10, %p51_p3  ;;  %p417_p13 = scmp.lt.s32.totalorder %s590_s11, 2 }
  0x11   : > { %s103_s22 = sand.u32 1, %s578_s8   ;;  %s403_s24 = smul.u32 56, %s586_s10 }
  0x12   : > { %s402_s23 = smul.u32 56, %s103_s22  ;;  %p410_p0 = pnand %p417_p13, %p648_p4 }
  0x13   : > { %s113_s27 = scalar_lea.hbm %s737_s0, %s403_s24  ;;  %p383_p1 = scmp.ge.s32.totalorder %s590_s11, 1 }
  0x14   : > { %s107_s28 = scalar_lea.vmem [#allocation2], %s402_s23  ;;  %s114_s30 = sshll.u32 %s113_s27, 4  ;;  %s115_s30 = int_to_ptr.hbm [resolvable:$true] %s114_s30 }
  0x15   : > { %s116_s29 = sshll.u32 %s107_s28, 4  ;;  %s104_s2 = scalar_lea.sflag [#allocation3], %s103_s22  ;;  %s117_s29 = int_to_ptr.vmem [resolvable:$true] %s116_s29 }
  0x16   : > { %s592_s3 = smov 128   ;;  %s593_s4 = smov 8  }
  0x17   : > { %412 = dma.hbm_to_vmem [thread:$0]  (!%p410_p0), %s115_s30, 896, %s117_s29, %s104_s2, %s592_s3, %s592_s3, %s593_s4  }
  0x18   : > { %p124_p2 = scmp.lt.s32.totalorder %s590_s11, 3 }
  0x1a   : > { %p125_p3 = pnand %p383_p1, %p124_p2 }
  0x1b   : > { %s681_s5 = sand.u32 (!%p125_p3), 1, %s574_s7  }
  0x1c   : > { %128 = sbr.rel (%p125_p3) target bundleno = 126 (0x7e), region = 24  ;;  %s131_s13 = scalar_lea.sflag (!%p125_p3), [#allocation3], %s681_s5 }
  0x1d   : > { %s404_s12 = smul.u32 (!%p125_p3), 56, %s681_s5 }
  0x1f   : > { %s685_s15 = scalar_lea.vmem (!%p125_p3), [#allocation2], %s404_s12 }
  0x21   : > { %561 = dma.done.wait (%p654_p8), %s131_s13, 896  }
  0x22   : > { %563 = vsyncadd (%p654_p8), %s131_s13, 4294966400  ;;  %v387_v0 = vld [vmem:[%s685_s15 + $0x18] sm:$0xff]  ;;  %v388_v1 = vld [vmem:[%s685_s15 + $0x20] sm:$0xff]  ;;  %v594_v11 = vmov 0.0   ;;  %s384_s16 = sshll.u32 %s681_s5, 4  ;;  %s401_s17 = sshll.u32 %s582_s9, 4 }
  0x23   : > { %v389_v2 = vld [vmem:[%s685_s15 + $0x28] sm:$0xff]  ;;  %v390_v3 = vld [vmem:[%s685_s15 + $0x30] sm:$0xff]  ;;  %v167_v4 = vmul.f32 %v387_v0, %v387_v0  ;;  %v168_v5 = vmul.f32 %v388_v1, %v388_v1  ;;  %v154_v63 = vld [vmem:[%s685_s15] sm:$0xff]  ;;  %s289_s23 = scalar_lea.hbm %s738_s1, %s401_s17  ;;  %s153_s24 = scalar_lea.vmem [#allocation5], %s384_s16 }
  0x24   : > { %v170_v6 = vmul.f32 %v389_v2, %v389_v2  ;;  %v172_v8 = vmul.f32 %v390_v3, %v390_v3  ;;  %s290_s25 = sshll.u32 %s153_s24, 4  ;;  %s292_s9 = sshll.u32 %s289_s23, 4  ;;  %s291_s25 = int_to_ptr.vmem [resolvable:$true] %s290_s25  ;;  %s293_s9 = int_to_ptr.hbm [resolvable:$true] %s292_s9 }
  0x25   : > { %v169_v7 = vadd.f32 %v168_v5, %v167_v4  ;;  %s277_s26 = scalar_lea.sflag [#allocation4], %s681_s5  ;;  %s522_s27 = sshra.s32 %s293_s9, 4  ;;  %s523_s27 = int_to_ptr.hbm [resolvable:$true] %s522_s27 }
  0x26   : > { %s524_s28 = scalar_lea.hbm %s523_s27, 16  ;;  %s528_s2 = scalar_lea.hbm %s738_s1, 32 }
  0x27   : > { %v171_v9 = vadd.f32 %v170_v6, %v169_v7  ;;  %p525_p4 = scmp.ne.s32.totalorder %s523_s27, %s524_s28  ;;  %p529_p7 = scmp.lt.s32.totalorder %s523_s27, %s738_s1 }
  0x28   : > { %p530_p8 = scmp.lt.s32.totalorder %s528_s2, %s524_s28 }
  0x29   : > { %v173_v10 = vadd.f32 %v172_v8, %v171_v9  ;;  %p526_p5 = pnand %p525_p4, %p658_p9 }
  0x2a   : > { %p531_p10 = por %p530_p8, %p529_p7 }
  0x2b   : > { %vm174_vm0 = vcmp.eq.f32.partialorder %v173_v10, 0.0  ;;  %p527_p6 = pneg %p526_p5 }
  0x2c   : > { %v391_v12 = vsel %vm174_vm0, 1.0, %v594_v11 }
  0x2d   : > { %v177_v13 = vadd.f32 %v391_v12, %v387_v0  ;;  %v178_v14 = vadd.f32 %v391_v12, %v388_v1  ;;  %v179_v15 = vadd.f32 %v391_v12, %v389_v2  ;;  %v180_v16 = vadd.f32 %v391_v12, %v390_v3  ;;  %v385_v0 = vld [vmem:[%s685_s15 + $0x8] sm:$0xff]  ;;  %v386_v2 = vld [vmem:[%s685_s15 + $0x10] sm:$0xff]  ;;  %p532_p13 = pnand %p531_p10, %p527_p6 }
  0x2f   : > { %v181_v17 = vmul.f32 %v177_v13, %v177_v13  ;;  %v182_v18 = vmul.f32 %v178_v14, %v178_v14  ;;  %v184_v19 = vmul.f32 %v179_v15, %v179_v15  ;;  %v186_v21 = vmul.f32 %v180_v16, %v180_v16 }
  0x31   : > { %v183_v20 = vadd.f32 %v182_v18, %v181_v17 }
  0x33   : > { %v185_v22 = vadd.f32 %v184_v19, %v183_v20 }
  0x35   : > { %v187_v23 = vadd.f32 %v186_v21, %v185_v22 }
  0x37   : > { %472 = vrsqrt.f32 %v187_v23  ;;  %vm194_vm1 = vweird.f32 %v187_v23 }
  0x3d   : > { %v473_v24 = vpop.eup %472 }
  0x3e   : > { %v189_v25 = vmul.f32 %v473_v24, %v187_v23  ;;  %vm195_vm2 = vweird.f32 %v473_v24 }
  0x3f   : > { %vm196_vm3 = vmor %vm194_vm1, %vm195_vm2 }
  0x40   : > { %v190_v26 = vmul.f32 %v473_v24, %v189_v25 }
  0x42   : > { %v191_v27 = vmul.f32 0.5, %v190_v26 }
  0x44   : > { %v192_v28 = vsub.f32 1.5, %v191_v27 }
  0x46   : > { %v193_v29 = vmul.f32 %v473_v24, %v192_v28 }
  0x48   : > { %v197_v30 = vsel %vm196_vm3, %v473_v24, %v193_v29 }
  0x49   : > { %v198_v31 = vmul.f32 %v197_v30, %v177_v13  ;;  %v199_v32 = vmul.f32 %v197_v30, %v178_v14  ;;  %v200_v33 = vmul.f32 %v197_v30, %v179_v15  ;;  %v201_v34 = vmul.f32 %v197_v30, %v180_v16 }
  0x4b   : > { %v202_v35 = vmul.f32 %v198_v31, %v198_v31  ;;  %v203_v36 = vmul.f32 %v199_v32, %v199_v32  ;;  %v204_v37 = vmul.f32 %v200_v33, %v200_v33  ;;  %v205_v38 = vmul.f32 %v199_v32, %v198_v31 }
  0x4c   : > { %v206_v39 = vmul.f32 %v200_v33, %v198_v31  ;;  %v207_v40 = vmul.f32 %v201_v34, %v198_v31  ;;  %v208_v41 = vmul.f32 %v200_v33, %v199_v32  ;;  %v209_v42 = vmul.f32 %v201_v34, %v199_v32 }
  0x4d   : > { %v210_v43 = vmul.f32 %v201_v34, %v200_v33  ;;  %v211_v44 = vadd.f32 %v204_v37, %v203_v36  ;;  %v230_v45 = vadd.f32 %v203_v36, %v202_v35 }
  0x4e   : > { %v215_v46 = vsub.f32 %v206_v39, %v209_v42  ;;  %v222_v47 = vadd.f32 %v208_v41, %v207_v40  ;;  %v226_v48 = vadd.f32 %v209_v42, %v206_v39 }
  0x4f   : > { %v212_v49 = vmul.f32 2.0, %v211_v44  ;;  %v219_v50 = vsub.f32 %v205_v38, %v210_v43  ;;  %v231_v51 = vmul.f32 2.0, %v230_v45 }
  0x50   : > { %v216_v52 = vmul.f32 2.0, %v215_v46  ;;  %v223_v53 = vmul.f32 2.0, %v222_v47  ;;  %v227_v54 = vmul.f32 2.0, %v226_v48 }
  0x51   : > { %v213_v55 = vmul.f32 0.09, %v212_v49  ;;  %v220_v56 = vmul.f32 2.0, %v219_v50  ;;  %v232_v57 = vmul.f32 -0.2, %v231_v51 }
  0x52   : > { %v217_v58 = vmul.f32 -0.2, %v216_v52  ;;  %v224_v59 = vmul.f32 -0.2, %v223_v53  ;;  %v228_v60 = vmul.f32 0.09, %v227_v54 }
  0x53   : > { %v214_v61 = vsub.f32 0.09, %v213_v55  ;;  %v221_v62 = vmul.f32 0.09, %v220_v56 }
  0x54   : > { %v229_v1 = vadd.f32 -0.2, %v228_v60 }
  0x55   : > { %v218_v3 = vadd.f32 %v217_v58, %v214_v61  ;;  %v225_v4 = vadd.f32 %v224_v59, %v221_v62 }
  0x56   : > { %v233_v5 = vsub.f32 %v229_v1, %v232_v57 }
  0x57   : > { %v234_v6 = vadd.f32 %v218_v3, %v154_v63  ;;  %v235_v7 = vadd.f32 %v385_v0, %v225_v4 }
  0x58   : > { %v236_v8 = vadd.f32 %v386_v2, %v233_v5 }
  0x59   : > { %v393_v9 = vadd.f32 0.08, %v235_v7  ;;  %v394_v10 = vadd.f32 -0.08, %v235_v7  ;;  %v238_v12 = vmul.f32 %v234_v6, %v234_v6 }
  0x5a   : > { %v392_v11 = vadd.f32 0.22, %v236_v8 }
  0x5b   : > { %v243_v14 = vmul.f32 %v393_v9, %v393_v9  ;;  %v259_v15 = vmul.f32 %v394_v10, %v394_v10 }
  0x5c   : > { %v239_v13 = vmul.f32 %v392_v11, %v392_v11 }
  0x5e   : > { %v240_v16 = vadd.f32 %v239_v13, %v238_v12 }
  0x60   : > { %v244_v17 = vadd.f32 %v243_v14, %v240_v16  ;;  %v260_v18 = vadd.f32 %v259_v15, %v240_v16 }
  0x62   : > { %474 = vrsqrt.f32 %v244_v17  ;;  %vm252_vm4 = vcmp.eq.f32.partialorder %v244_v17, inf  ;;  %v255_v30 = vand.u32 2147483648, %v244_v17  ;;  %vm254_vm5 = vcmp.eq.f32.partialorder %v244_v17, 0.0 }
  0x63   : > { %476 = vrsqrt.f32 %v260_v18  ;;  %vm268_vm6 = vcmp.eq.f32.partialorder %v260_v18, inf  ;;  %v271_v33 = vand.u32 2147483648, %v260_v18  ;;  %vm270_vm7 = vcmp.eq.f32.partialorder %v260_v18, 0.0 }
  0x68   : > { %v475_v19 = vpop.eup %474 }
  0x69   : > { %v477_v20 = vpop.eup %476  ;;  %v246_v21 = vmul.f32 %v475_v19, %v244_v17 }
  0x6a   : > { %v262_v22 = vmul.f32 %v477_v20, %v260_v18 }
  0x6b   : > { %v247_v23 = vmul.f32 %v475_v19, %v246_v21 }
  0x6c   : > { %v263_v24 = vmul.f32 %v477_v20, %v262_v22 }
  0x6d   : > { %v248_v25 = vmul.f32 0.5, %v247_v23 }
  0x6e   : > { %v264_v26 = vmul.f32 0.5, %v263_v24 }
  0x6f   : > { %v249_v27 = vsub.f32 1.5, %v248_v25 }
  0x70   : > { %v265_v28 = vsub.f32 1.5, %v264_v26 }
  0x71   : > { %v250_v29 = vmul.f32 %v475_v19, %v249_v27 }
  0x72   : > { %v266_v31 = vmul.f32 %v477_v20, %v265_v28 }
  0x73   : > { %v251_v32 = vmul.f32 %v250_v29, %v244_v17 }
  0x74   : > { %v267_v34 = vmul.f32 %v266_v31, %v260_v18 }
  0x75   : > { %v253_v35 = vsel %vm252_vm4, %v244_v17, %v251_v32 }
  0x76   : > { %v256_v36 = vsel %vm254_vm5, %v255_v30, %v253_v35  ;;  %v269_v37 = vsel %vm268_vm6, %v260_v18, %v267_v34 }
  0x77   : > { %v257_v38 = vmul.f32 2.915452, %v256_v36  ;;  %v272_v39 = vsel %vm270_vm7, %v271_v33, %v269_v37 }
  0x78   : > { %v273_v40 = vmul.f32 2.915452, %v272_v39 }
  0x79   : > { %258 = vst [vmem:[%s153_s24] sm:$0xff] %v257_v38 }
  0x7a   : > { %395 = vst [vmem:[%s153_s24 + $0x8] sm:$0xff] %v273_v40 }
  0x7b   : > { %535 = shalt.err (!%p532_p13)
}
  0x7c   : > { %s595_s5 = smov 128   ;;  %s596_s12 = smov 8  }
  0x7d   : > { %407 = dma.vmem_to_hbm [thread:$0]  (%p658_p9), %s291_s25, 256, %s293_s9, %s277_s26, %s595_s5, %s595_s5, %s596_s12  }
  0x7e PF: > { %s307_s13 = sand.u32 1, %s570_s6   ;;  %p414_p0 = pnand %p381_p12, %p665_p11 }
  0x7f   : > { %s308_s15 = scalar_lea.sflag [#allocation4], %s307_s13 }
  0x80   : > { %p415_p1 = pneg %p414_p0 }
  0x82   : > { %565 = dma.done.wait (%p415_p1), %s308_s15, 256  }
  0x83   : > { %567 = vsyncadd (%p415_p1), %s308_s15, 4294967040  ;;  %s17_s11 = sadd.s32 1, %s590_s11   ;;  %s743_s6 = smov %s574_s7 }
  0x84   : > { %p14_p2 = scmp.ge.s32.totalorder %s17_s11, 4   ;;  %s744_s7 = smov %s578_s8 }
  0x85   : > { %s745_s8 = smov %s663_s20  ;;  %s746_s9 = smov %s586_s10 }
  0x86   : > { %s747_s10 = smov %s749_s14  ;;  %16 = sbr.rel (!%p14_p2) target bundleno = 6 (0x6), region = 76 }
  0x8b   :  { %314 = vsyncpa [#allocation3], 1 }
  0x8c   :  { %316 = vsyncpa [#allocation3 + $0x1], 1 }
  0x8d   :  { %317 = vsyncpa [#allocation4], 1 }
  0x8e   :  { %319 = vsyncpa [#allocation4 + $0x1], 1 }

</bundles_post_ra>
